<compile_context>
chip_gen: v7x
topology: tpu7x:2x2x1
jax: 0.10.0
libtpu: 0.0.40
codegen_flags: <defaults>
</compile_context>

<pallas_src>
import numpy as np
import jax
import jax.numpy as jnp
from jax.experimental import pallas as pl
from jax.experimental.pallas import tpu as pltpu

# Fixed hyper-parameters — match SpatialEmbLoss.__init__ defaults.
TO_CENTER = True
N_SIGMA = 1
NUM_CLASS = 1
CLASS_WEIGHT = [1.0]

assert N_SIGMA in (1, 2)                  # torch broadcast of exp(10*s) against (2,H,W)
assert 2 % N_SIGMA == 0                   # sigma channels [2 : 2+N_SIGMA] land on a block boundary
assert (2 + N_SIGMA) % NUM_CLASS == 0     # seed channels land on a block boundary

_INV_1023 = np.float32(1.0 / 1023.0)      # xym buffer is linspace(0, 1, 1024) -> step 1/1023
_VMEM_LIMIT = 32 * 1024 * 1024            # > v5e default (16 MiB), <= half of v7x physical (64 MiB)


def _pick_tile_h(h):
    """Largest multiple-of-32 row tile dividing h; else the full height."""
    for th in (512, 480, 448, 416, 384, 352, 320, 288, 256, 224, 192, 160, 128, 96, 64, 32):
        if h % th == 0:
            return th
    return h


def _lane_iota():
    return jax.lax.broadcasted_iota(jnp.int32, (8, 128), 1)


def _coord_planes(th, w, h_tile_idx):
    """xym coordinate planes for the current (TH, W) row tile, built from iota (no HBM input)."""
    row = jax.lax.broadcasted_iota(jnp.int32, (th, w), 0) + h_tile_idx * th
    col = jax.lax.broadcasted_iota(jnp.int32, (th, w), 1)
    ym = row.astype(jnp.float32) * _INV_1023
    xm = col.astype(jnp.float32) * _INV_1023
    return xm, ym


# --------------------------------------------------------------------------------------
# Kernel 1: background seed reduction  sum(sigmoid(seed)^2 * (label == 0))   per (batch, class)
# Accumulates over the innermost row-tile axis (standard init/accumulate pattern).
# --------------------------------------------------------------------------------------
def _bg_kernel(pred_ref, label_ref, bg_ref):
    h = pl.program_id(1)
    seed = jax.nn.sigmoid(pred_ref[0])                   # (NUM_CLASS, TH, W)
    lab = label_ref[0].astype(jnp.float32)               # (TH, W) from int8
    bg = jnp.where(lab == 0.0, 1.0, 0.0)

    lane = _lane_iota()
    tile = jnp.zeros((8, 128), jnp.float32)
    for c in range(NUM_CLASS):                           # static unroll; class sums lane-packed
        tile = tile + jnp.where(lane == c, jnp.sum(seed[c] * seed[c] * bg), 0.0)

    @pl.when(h == 0)
    def _():
        bg_ref[...] = jnp.zeros_like(bg_ref)

    bg_ref[0] = bg_ref[0] + tile


def _bg_call(pred, labels_i8, tile_h):
    b, c, h, w = pred.shape
    n_h = h // tile_h
    seed_blk = (2 + N_SIGMA) // NUM_CLASS
    return pl.pallas_call(
        _bg_kernel,
        out_shape=jax.ShapeDtypeStruct((b, 8, 128), jnp.float32),
        grid=(b, n_h),
        in_specs=[
            pl.BlockSpec((1, NUM_CLASS, tile_h, w), lambda bi, hi: (bi, seed_blk, hi, 0)),
            pl.BlockSpec((1, tile_h, w), lambda bi, hi: (bi, hi, 0)),
        ],
        out_specs=pl.BlockSpec((1, 8, 128), lambda bi, hi: (bi, 0, 0)),
        compiler_params=pltpu.CompilerParams(
            dimension_semantics=("parallel", "arbitrary"),
            vmem_limit_bytes=_VMEM_LIMIT),
    )(pred, labels_i8)


# --------------------------------------------------------------------------------------
# Kernel 2: per-instance masked sums.  Grid (n_h, N) with N innermost so the sigma block
# (index depends only on bidx[i]) is reused across same-batch instances.  Each (hi, i)
# writes its own (8,128) partial block exactly once; n_h is reduced in JAX.
# Lane layout (all 8 sublanes carry the same value):
#   lane 0: count, lane 1: sum_x, lane 2: sum_y,
#   lanes 3..3+N_SIGMA-1: sum(sigma_c),  lanes 3+N_SIGMA..3+2*N_SIGMA-1: sum(sigma_c^2)
# --------------------------------------------------------------------------------------
def _inst_stats_kernel(bidx_ref, sigma_ref, mask_ref, stats_ref):
    del bidx_ref                                         # only used by the index_maps
    hi = pl.program_id(0)
    sig = sigma_ref[0]                                   # (N_SIGMA, TH, W) raw sigma channels
    m = mask_ref[0].astype(jnp.float32)                  # (TH, W) from int8
    th, w = m.shape
    xm, ym = _coord_planes(th, w, hi)

    lane = _lane_iota()
    tile = (jnp.where(lane == 0, jnp.sum(m), 0.0)
            + jnp.where(lane == 1, jnp.sum(xm * m), 0.0)
            + jnp.where(lane == 2, jnp.sum(ym * m), 0.0))
    for c in range(N_SIGMA):
        sc = sig[c]
        tile = tile + jnp.where(lane == 3 + c, jnp.sum(sc * m), 0.0)
        tile = tile + jnp.where(lane == 3 + N_SIGMA + c, jnp.sum(sc * sc * m), 0.0)

    stats_ref[0, 0] = tile                               # written exactly once per (hi, i)


def _stats_call(bidx, pred, masks_i8, tile_h):
    n, h, w = masks_i8.shape
    n_h = h // tile_h
    sig_blk = 2 // N_SIGMA
    grid_spec = pltpu.PrefetchScalarGridSpec(
        num_scalar_prefetch=1,
        grid=(n_h, n),
        in_specs=[
            pl.BlockSpec((1, N_SIGMA, tile_h, w), lambda hi, i, bi: (bi[i], sig_blk, hi, 0)),
            pl.BlockSpec((1, tile_h, w), lambda hi, i, bi: (i, hi, 0)),
        ],
        out_specs=pl.BlockSpec((1, 1, 8, 128), lambda hi, i, bi: (hi, i, 0, 0)),
    )
    return pl.pallas_call(
        _inst_stats_kernel,
        grid_spec=grid_spec,
        out_shape=jax.ShapeDtypeStruct((n_h, n, 8, 128), jnp.float32),
        compiler_params=pltpu.CompilerParams(
            dimension_semantics=("parallel", "parallel"),
            vmem_limit_bytes=_VMEM_LIMIT),
    )(bidx, pred, masks_i8)


# --------------------------------------------------------------------------------------
# Kernel 3: lovasz logits (2*dist - 1) + in-mask seed reduction, per instance.
# Grid (n_h, N) with N innermost: emb/seed blocks are reused across same-batch instances.
# Per-instance scalars (cx, cy, exp(10*s_mean)) arrive precomputed through an SMEM table.
# --------------------------------------------------------------------------------------
def _inst_dist_kernel(bidx_ref, cidx_ref, params_ref, emb_ref, seed_ref, mask_ref,
                      dist_ref, seedin_ref):
    del bidx_ref, cidx_ref                               # only used by the index_maps
    hi = pl.program_id(0)
    i = pl.program_id(1)
    cx = params_ref[4 * i + 0]
    cy = params_ref[4 * i + 1]
    sx = params_ref[4 * i + 2]
    sy = params_ref[4 * i + 3]

    pe = emb_ref[0]                                      # (2, TH, W) raw offset channels
    th, w = pe.shape[1], pe.shape[2]
    xm, ym = _coord_planes(th, w, hi)
    ex = jnp.tanh(pe[0]) + xm                            # spatial_emb, recomputed in-kernel
    ey = jnp.tanh(pe[1]) + ym

    dist = jnp.exp(-((ex - cx) ** 2 * sx + (ey - cy) ** 2 * sy))
    dist_ref[0] = 2.0 * dist - 1.0                       # lovasz logit transform fused here

    seed = jax.nn.sigmoid(seed_ref[0, 0])                # (TH, W) selected class seed map
    m = mask_ref[0].astype(jnp.float32)
    # TODO(synk): the original detaches dist inside this term; forward value is identical.
    seed_in = jnp.sum((seed - dist) ** 2 * m)
    seedin_ref[0, 0] = jnp.broadcast_to(seed_in, (8, 128))


def _dist_call(bidx, cidx, params_flat, pred, masks_i8, tile_h):
    n, h, w = masks_i8.shape
    n_h = h // tile_h
    grid_spec = pltpu.PrefetchScalarGridSpec(
        num_scalar_prefetch=2,
        grid=(n_h, n),
        in_specs=[
            pl.BlockSpec(memory_space=pltpu.MemorySpace.SMEM),                         # per-inst scalars
            pl.BlockSpec((1, 2, tile_h, w), lambda hi, i, bi, ci: (bi[i], 0, hi, 0)),  # offset channels
            pl.BlockSpec((1, 1, tile_h, w),
                         lambda hi, i, bi, ci: (bi[i], 2 + N_SIGMA + ci[i], hi, 0)),   # class seed channel
            pl.BlockSpec((1, tile_h, w), lambda hi, i, bi, ci: (i, hi, 0)),            # mask (int8)
        ],
        out_specs=(
            pl.BlockSpec((1, tile_h, w), lambda hi, i, bi, ci: (i, hi, 0)),            # lovasz logits
            pl.BlockSpec((1, 1, 8, 128), lambda hi, i, bi, ci: (hi, i, 0, 0)),         # seed_in partial
        ),
    )
    return pl.pallas_call(
        _inst_dist_kernel,
        grid_spec=grid_spec,
        out_shape=(
            jax.ShapeDtypeStruct((n, h, w), jnp.float32),
            jax.ShapeDtypeStruct((n_h, n, 8, 128), jnp.float32),
        ),
        compiler_params=pltpu.CompilerParams(
            dimension_semantics=("parallel", "parallel"),
            vmem_limit_bytes=_VMEM_LIMIT),
        # prediction is passed twice: once for the offset-channel view, once for the seed view.
    )(bidx, cidx, params_flat, pred, pred, masks_i8)


# --------------------------------------------------------------------------------------
# lovasz_hinge (standard Berman formulation, as used by SpatialEmbLoss).
# TODO(synk): data-dependent descending sort + cumsum has no clean Pallas equivalent;
#             implemented in plain JAX.
# --------------------------------------------------------------------------------------
def _lovasz_hinge_flat(logits, labels_i8):
    labels = labels_i8.astype(jnp.float32)
    signs = 2.0 * labels - 1.0
    errors = 1.0 - logits * signs
    order = jnp.argsort(-errors)                 # descending
    errors_sorted = errors[order]
    gt_sorted = labels[order]
    gts = jnp.sum(gt_sorted)
    intersection = gts - jnp.cumsum(gt_sorted)
    union = gts + jnp.cumsum(1.0 - gt_sorted)
    jaccard = 1.0 - intersection / union
    jaccard = jnp.concatenate([jaccard[:1], jaccard[1:] - jaccard[:-1]])
    return jnp.dot(jax.nn.relu(errors_sorted), jaccard)


# --------------------------------------------------------------------------------------
# Forward pass (equivalent to SpatialEmbLoss.forward with iou=False)
# --------------------------------------------------------------------------------------
def spatial_emb_loss(prediction, instances, labels, w_inst=1.0, w_var=10.0, w_seed=1.0):
    prediction = jnp.asarray(prediction, jnp.float32)
    B, C, H, W = prediction.shape
    assert C == 2 + N_SIGMA + NUM_CLASS
    assert H <= 1024 and W <= 1024, "original xym coordinate buffer is 1024x1024"
    tile_h = _pick_tile_h(H)

    lab_np = np.asarray(labels)
    inst_np = np.asarray(instances)
    labels_i8 = jnp.asarray(lab_np.astype(np.int8))

    # Background seed loss per (batch, class).  (It is 0 when there is no background.)
    bg_pad = _bg_call(prediction, labels_i8, tile_h)        # (B, 8, 128)
    bg_sum = bg_pad[:, 0, :NUM_CLASS]                       # (B, NUM_CLASS)

    # TODO(synk): enumeration of unique instance ids is data-dependent control flow; done on
    #             host (device->host sync) and fed to the Pallas grids via scalar prefetch.
    #             Instances are emitted sorted by (batch, class) so consecutive inner grid
    #             steps reuse the per-batch prediction blocks (Pallas skips repeated DMAs).
    masks, bidx, cidx = [], [], []
    for b in range(B):
        for cl in range(NUM_CLASS):
            label_mask = (lab_np[b] == cl + 1)
            inst_per_cls = inst_np[b] * label_mask
            ids = np.unique(inst_per_cls)
            ids = ids[ids != 0]
            for iid in ids:
                masks.append((inst_per_cls == iid).astype(np.int8))
                bidx.append(b)
                cidx.append(cl)

    N = len(masks)
    if N > 0:
        masks_i8 = jnp.asarray(np.stack(masks, axis=0))                 # (N, H, W) int8
        bidx_a = jnp.asarray(np.array(bidx, dtype=np.int32))
        cidx_a = jnp.asarray(np.array(cidx, dtype=np.int32))

        # Pass 1: masked sums, partial over row tiles, reduced over the tiny n_h axis here.
        stats_part = _stats_call(bidx_a, prediction, masks_i8, tile_h)  # (n_h, N, 8, 128)
        st = jnp.sum(stats_part, axis=0)[:, 0, :]                       # (N, 128)
        count = jnp.maximum(st[:, 0], 1.0)
        sum_x, sum_y = st[:, 1], st[:, 2]
        sum_s = st[:, 3:3 + N_SIGMA]
        sum_s2 = st[:, 3 + N_SIGMA:3 + 2 * N_SIGMA]
        s_mean = sum_s / count[:, None]
        # mean((sigma - s_mean.detach())^2) expanded from the masked sums (forward-exact).
        var_v = jnp.sum(jnp.maximum(sum_s2 - 2.0 * s_mean * sum_s
                                    + count[:, None] * s_mean ** 2, 0.0),
                        axis=1) / (count * N_SIGMA)

        # Per-instance scalars for the dist kernel, derived once here (SMEM table).
        cx = sum_x / count
        cy = sum_y / count
        s_exp = jnp.exp(10.0 * s_mean)                                  # (N, N_SIGMA)
        sx = s_exp[:, 0]
        sy = s_exp[:, 1] if N_SIGMA > 1 else s_exp[:, 0]
        params_flat = jnp.stack([cx, cy, sx, sy], axis=1).reshape(-1).astype(jnp.float32)

        # Pass 2: lovasz logits + in-mask seed term.
        logits, seedin_part = _dist_call(bidx_a, cidx_a, params_flat,
                                         prediction, masks_i8, tile_h)
        seedin_v = jnp.sum(seedin_part, axis=0)[:, 0, 0]                # (N,)
        lov_v = jax.vmap(_lovasz_hinge_flat)(logits.reshape(N, -1),
                                             masks_i8.reshape(N, -1))

        bidx_np = np.array(bidx)
        # NOTE: mirrors the original's `class_weight[cl - 1]` indexing (wraps for cl == 0).
        cw_np = np.array([CLASS_WEIGHT[c - 1] for c in cidx], dtype=np.float32)

    loss = jnp.zeros((), jnp.float32)
    for b in range(B):
        # bg term is 0 when the image has no background pixels -> add unconditionally.
        seed_loss = jnp.sum(bg_sum[b])
        instance_loss = jnp.zeros((), jnp.float32)
        var_loss = jnp.zeros((), jnp.float32)
        if N > 0:
            sel = np.nonzero(bidx_np == b)[0]
            if sel.size > 0:
                sel_j = jnp.asarray(sel.astype(np.int32))
                instance_loss = jnp.sum(lov_v[sel_j]) / sel.size
                var_loss = jnp.sum(var_v[sel_j]) / sel.size
                seed_loss = seed_loss + jnp.sum(jnp.asarray(cw_np[sel]) * seedin_v[sel_j])
        seed_loss = seed_loss / (H * W)
        loss = loss + w_inst * instance_loss + w_var * var_loss + w_seed * seed_loss
    return loss / B


if __name__ == "__main__":
    key = jax.random.PRNGKey(0)
    B, H, W = 2, 16, 16
    C = 2 + N_SIGMA + NUM_CLASS                  # 4 prediction channels

    prediction = jax.random.normal(key, (B, C, H, W), dtype=jnp.float32)

    # deterministic synthetic instance / semantic maps
    lab = np.zeros((B, H, W), np.int32)
    inst = np.zeros((B, H, W), np.int32)
    lab[:, 2:14, 2:14] = 1                       # class-1 region (rest is background)
    inst[:, 2:8, 2:8] = 1
    inst[:, 2:8, 8:14] = 2
    inst[:, 8:14, 2:14] = 3
    instances = jnp.asarray(inst)
    labels = jnp.asarray(lab)

    loss = spatial_emb_loss(prediction, instances, labels)
    jax.block_until_ready(loss)
    print("KERNEL_OK")
</pallas_src>

<mosaic_0001>
module attributes {stable_mosaic.version = 11 : i64} {
  func.func @_bg_kernel(%arg0: i32, %arg1: i32, %arg2: memref<1x1x16x16xf32, #tpu.memory_space<vmem>>, %arg3: memref<1x16x16xi8, #tpu.memory_space<vmem>>, %arg4: memref<1x8x128xf32, #tpu.memory_space<vmem>>) attributes {dimension_semantics = [#tpu.dimension_semantics<parallel>, #tpu.dimension_semantics<arbitrary>], iteration_bounds = array<i64: 2, 1>, scalar_prefetch = 0 : i64, scratch_operands = 0 : i64, tpu.core_type = #tpu.core_type<tc>, window_params = [{transform_indices = @transform_0, window_bounds = array<i64: 1, 1, 16, 16>}, {transform_indices = @transform_1, window_bounds = array<i64: 1, 16, 16>}, {transform_indices = @transform_2, window_bounds = array<i64: 1, 8, 128>}]} {
    %c0 = arith.constant 0 : index
    %c0_0 = arith.constant 0 : index
    %c0_1 = arith.constant 0 : index
    %c0_2 = arith.constant 0 : index
    %0 = vector.load %arg2[%c0, %c0_0, %c0_1, %c0_2] : memref<1x1x16x16xf32, #tpu.memory_space<vmem>>, vector<1x1x16x16xf32>
    %1 = vector.shape_cast %0 : vector<1x1x16x16xf32> to vector<1x16x16xf32>
    %2 = arith.negf %1 : vector<1x16x16xf32>
    %3 = math.exp %2 : vector<1x16x16xf32>
    %cst = arith.constant 1.000000e+00 : f32
    %4 = vector.broadcast %cst : f32 to vector<1x16x16xf32>
    %5 = arith.addf %4, %3 : vector<1x16x16xf32>
    %6 = arith.divf %4, %5 : vector<1x16x16xf32>
    %c0_3 = arith.constant 0 : index
    %c0_4 = arith.constant 0 : index
    %c0_5 = arith.constant 0 : index
    %7 = vector.load %arg3[%c0_3, %c0_4, %c0_5] : memref<1x16x16xi8, #tpu.memory_space<vmem>>, vector<1x16x16xi8>
    %8 = vector.shape_cast %7 : vector<1x16x16xi8> to vector<16x16xi8>
    %9 = arith.sitofp %8 : vector<16x16xi8> to vector<16x16xf32>
    %cst_6 = arith.constant 0.000000e+00 : f32
    %10 = vector.broadcast %cst_6 : f32 to vector<16x16xf32>
    %11 = arith.cmpf oeq, %9, %10 : vector<16x16xf32>
    %cst_7 = arith.constant 1.000000e+00 : f32
    %cst_8 = arith.constant 0.000000e+00 : f32
    %12 = vector.broadcast %cst_7 : f32 to vector<16x16xf32>
    %13 = vector.broadcast %cst_8 : f32 to vector<16x16xf32>
    %14 = arith.select %11, %12, %13 : vector<16x16xi1>, vector<16x16xf32>
    %15 = tpu.iota {dimensions = array<i32: 1>} : vector<8x128xi32>
    %cst_9 = arith.constant 0.000000e+00 : f32
    %16 = vector.broadcast %cst_9 : f32 to vector<8x128xf32>
    %c0_i32 = arith.constant 0 : i32
    %17 = vector.broadcast %c0_i32 : i32 to vector<8x128xi32>
    %18 = arith.cmpi eq, %15, %17 : vector<8x128xi32>
    %19 = vector.shape_cast %6 : vector<1x16x16xf32> to vector<16x16xf32>
    %20 = vector.shape_cast %6 : vector<1x16x16xf32> to vector<16x16xf32>
    %21 = arith.mulf %19, %20 : vector<16x16xf32>
    %22 = arith.mulf %21, %14 : vector<16x16xf32>
    %23 = vector.shape_cast %22 : vector<16x16xf32> to vector<1x16x16xf32>
    %cst_10 = arith.constant dense<0.000000e+00> : vector<1xf32>
    %24 = vector.multi_reduction <add>, %23, %cst_10 [1, 2] : vector<1x16x16xf32> to vector<1xf32>
    %25 = vector.shape_cast %24 : vector<1xf32> to vector<1x1x1xf32>
    %26 = vector.extract %25[0, 0, 0] : f32 from vector<1x1x1xf32>
    %cst_11 = arith.constant 0.000000e+00 : f32
    %27 = vector.broadcast %26 : f32 to vector<8x128xf32>
    %28 = vector.broadcast %cst_11 : f32 to vector<8x128xf32>
    %29 = arith.select %18, %27, %28 : vector<8x128xi1>, vector<8x128xf32>
    %30 = arith.addf %16, %29 : vector<8x128xf32>
    %c0_i32_12 = arith.constant 0 : i32
    %31 = arith.cmpi eq, %arg1, %c0_i32_12 : i32
    %32 = arith.extui %31 : i1 to i32
    %c0_i32_13 = arith.constant 0 : i32
    %33 = arith.cmpi ne, %32, %c0_i32_13 : i32
    scf.if %33 {
      %cst_20 = arith.constant 0.000000e+00 : f32
      %40 = vector.broadcast %cst_20 : f32 to vector<1x8x128xf32>
      %c0_21 = arith.constant 0 : index
      %c0_22 = arith.constant 0 : index
      %c0_23 = arith.constant 0 : index
      %41 = vector.load %arg4[%c0_21, %c0_22, %c0_23] : memref<1x8x128xf32, #tpu.memory_space<vmem>>, vector<1x8x128xf32>
      tpu.vector_store %arg4[%c0_21, %c0_22, %c0_23], %40 {strides = array<i32>} : memref<1x8x128xf32, #tpu.memory_space<vmem>>, vector<1x8x128xf32>,
    } else {
    }
    %c0_14 = arith.constant 0 : index
    %c0_15 = arith.constant 0 : index
    %c0_16 = arith.constant 0 : index
    %34 = vector.load %arg4[%c0_14, %c0_15, %c0_16] : memref<1x8x128xf32, #tpu.memory_space<vmem>>, vector<1x8x128xf32>
    %35 = vector.shape_cast %34 : vector<1x8x128xf32> to vector<8x128xf32>
    %36 = arith.addf %35, %30 : vector<8x128xf32>
    %c0_17 = arith.constant 0 : index
    %c0_18 = arith.constant 0 : index
    %c0_19 = arith.constant 0 : index
    %37 = vector.load %arg4[%c0_17, %c0_18, %c0_19] : memref<1x8x128xf32, #tpu.memory_space<vmem>>, vector<1x8x128xf32>
    %38 = vector.shape_cast %37 : vector<1x8x128xf32> to vector<8x128xf32>
    %39 = vector.shape_cast %36 : vector<8x128xf32> to vector<1x8x128xf32>
    tpu.vector_store %arg4[%c0_17, %c0_18, %c0_19], %39 {strides = array<i32>} : memref<1x8x128xf32, #tpu.memory_space<vmem>>, vector<1x8x128xf32>,
    return
  }
  func.func @transform_0(%arg0: i32, %arg1: i32) -> (i32, i32, i32, i32) {
    %c3_i32 = arith.constant 3 : i32
    %c0_i32 = arith.constant 0 : i32
    %c0_i32_0 = arith.constant 0 : i32
    return %arg0, %c3_i32, %arg1, %c0_i32 : i32, i32, i32, i32
  }
  func.func @transform_1(%arg0: i32, %arg1: i32) -> (i32, i32, i32) {
    %c0_i32 = arith.constant 0 : i32
    %c0_i32_0 = arith.constant 0 : i32
    return %arg0, %arg1, %c0_i32 : i32, i32, i32
  }
  func.func @transform_2(%arg0: i32, %arg1: i32) -> (i32, i32, i32) {
    %c0_i32 = arith.constant 0 : i32
    %c0_i32_0 = arith.constant 0 : i32
    %c0_i32_1 = arith.constant 0 : i32
    return %arg0, %c0_i32, %c0_i32_0 : i32, i32, i32
  }
}

</mosaic_0001>

<bundles_post_ra>
// kernel: tpu_custom_call.1
= control target key start
LH: loop header
LB: loop body
LE: loop exit
PB: predicated region body
PF: predicated region fallthrough
CT: control target
= control target key end

     0   :  { %7 = vsyncpa [#allocation3], 0  ;;  %s907_s0 = inlined_call_operand.hbm [shape: f32[2,4,16,16], index: 0, kind: input, shape index: {}]   ;;  %s908_s1 = inlined_call_operand.hbm [shape: s8[2,16,16], index: 1, kind: input, shape index: {}]   ;;  %s909_s2 = inlined_call_operand.hbm [shape: f32[2,8,128], index: 2, kind: output, shape index: {}]  }
   0x1   :  { %9 = vsyncpa [#allocation3 + $0x1], 0 }
   0x2   :  { %10 = vsyncpa [#allocation6], 0 }
   0x3   :  { %12 = vsyncpa [#allocation6 + $0x1], 0 }
   0x4   :  { %13 = vsyncpa [#allocation4], 0 }
   0x5   :  { %15 = vsyncpa [#allocation4 + $0x1], 0  ;;  %s682_s9 = smov 0   ;;  %s684_s10 = smov 0  }
   0x6   :  { %s686_s11 = smov 0   ;;  %s688_s12 = smov 0  }
   0x7   :  { %s690_s13 = smov 0   ;;  %s692_s14 = smov 0  }
   0x8 LB: > { %s402_s15 = sadd.s32 4294967295, %s657_s14   ;;  %s403_s16 = sadd.s32 4294967294, %s657_s14   ;;  %s657_s14 = sphi %s692_s14, %s21_s14   ;;  %s653_s13 = sphi %s690_s13, %s928_s13   ;;  %s649_s12 = sphi %s688_s12, %s927_s12   ;;  %s645_s11 = sphi %s686_s11, %s926_s11   ;;  %s641_s10 = sphi %s684_s10, %s925_s10   ;;  %s637_s9 = sphi %s682_s9, %s924_s9  }
   0x9   : > { %s33_s17 = sadd.s32 1, %s653_s13  ;;  %s42_s18 = sadd.s32 1, %s645_s11 }
   0xa   : > { %p35_p0 = scmp.ge.s32.totalorder %s33_s17, 2  ;;  %p49_p1 = scmp.ne.s32.totalorder %s645_s11, %s641_s10 }
   0xb   : > { %p50_p2 = scmp.eq.s32.totalorder %s657_s14, 0  ;;  %p55_p3 = scmp.ne.s32.totalorder %s641_s10, %s637_s9 }
   0xc   : > { %s930_s17 = smov (%p35_p0, %s33_s17), 0  ;;  %p56_p5 = scmp.eq.s32.totalorder %s402_s15, 0 }
   0xd   : > { %p723_p4 = por %p50_p2, %p49_p1  ;;  %s37_s20 = ssub.s32 %s653_s13, %s930_s17 }
   0xe   : > { %p107_p6 = scmp.eq.s32.totalorder %s402_s15, 1  ;;  %p40_p7 = scmp.eq.s32.totalorder %s37_s20, 0 }
   0xf   : > { %p729_p8 = por %p56_p5, %p55_p3  ;;  %p113_p10 = scmp.eq.s32.totalorder %s403_s16, 1 }
  0x10   : > { %p733_p9 = por %p107_p6, %p49_p1  ;;  %p447_p13 = scmp.lt.s32.totalorder %s657_s14, 2 }
  0x11   : > { %s913_s21 = scalar_select %p729_p8, 1, 0 }
  0x12   : > { %s914_s22 = scalar_select %p733_p9, 1, 0 }
  0x13   : > { %s738_s23 = scalar_select %p40_p7, %s645_s11, %s42_s18  }
  0x14   : > { %p740_p11 = por %p113_p10, %p55_p3  ;;  %s747_s25 = sand.u32 1, %s645_s11  }
  0x15   : > { %s406_s26 = sshll.u32 %s747_s25, 4  ;;  %s422_s27 = sshll.u32 %s653_s13, 10 }
  0x16   : > { %s915_s24 = scalar_select %p740_p11, 1, 0 }
  0x17   : > { %s328_s30 = scalar_lea.hbm %s907_s0, %s422_s27  ;;  %s137_s3 = scalar_lea.vmem [#allocation2], %s406_s26 }
  0x18   : > { %s147_s4 = sshll.u32 %s137_s3, 4  ;;  %s754_s5 = scalar_lea.hbm %s328_s30, 768  ;;  %s756_s4 = int_to_ptr.vmem [resolvable:$true] %s147_s4 }
  0x19   : > { %p760_p0 = pnand %p447_p13, %p723_p4  ;;  %s134_s7 = scalar_lea.sflag [#allocation3], %s747_s25 }
  0x1a   : > { %s540_s8 = scalar_lea.hbm %s328_s30, 1024  ;;  %s515_s18 = scalar_lea.hbm %s907_s0, 2048 }
  0x1b   : > { %p511_p3 = scmp.ne.s32.totalorder %s754_s5, %s540_s8  ;;  %p512_p5 = pneg %p760_p0 }
  0x1c   : > { %p516_p4 = scmp.lt.u32.totalorder %s754_s5, %s907_s0  ;;  %p517_p10 = scmp.lt.u32.totalorder %s515_s18, %s540_s8 }
  0x1d   : > { %p513_p6 = pnand %p512_p5, %p511_p3  ;;  %p519_p12 = scmp.lt.u32.totalorder %s540_s8, %s754_s5 }
  0x1e   : > { %p518_p13 = por %p517_p10, %p516_p4 }
  0x1f   : > { %p514_p7 = pneg %p513_p6 }
  0x20   : > { %p520_p1 = por %p519_p12, %p518_p13 }
  0x22   : > { %p521_p2 = pnand %p520_p1, %p514_p7 }
  0x24   : > { %524 = shalt.err (!%p521_p2)
}
  0x25   : > { %s525_s26 = scalar_lea.vmem %s756_s4, 256  ;;  %s659_s27 = smov [#allocation2]  }
  0x26   : > { %p526_p3 = scmp.ne.s32.totalorder %s756_s4, %s525_s26  ;;  %s530_s28 = sshll.u32 %s659_s27, 4  ;;  %s531_s28 = int_to_ptr.vmem [resolvable:$false] %s530_s28 }
  0x27   : > { %s532_s29 = scalar_lea.vmem %s531_s28, 512  ;;  %p533_p9 = scmp.lt.s32.totalorder %s756_s4, %s531_s28 }
  0x28   : > { %p528_p6 = pnand %p526_p3, %p512_p5  ;;  %p534_p4 = scmp.lt.s32.totalorder %s532_s29, %s525_s26 }
  0x2a   : > { %p529_p11 = pneg %p528_p6  ;;  %p535_p10 = por %p534_p4, %p533_p9 }
  0x2c   : > { %p536_p12 = pnand %p535_p10, %p529_p11 }
  0x2e   : > { %539 = shalt.err (!%p536_p12)
}
  0x2f   : > { %s660_s30 = smov 128   ;;  %s661_s3 = smov 8  }
  0x30   : > { %439 = dma.hbm_to_vmem [thread:$0]  (!%p760_p0), %s754_s5, 256, %s756_s4, %s134_s7, %s660_s30, %s660_s30, %s661_s3  }
  0x31   : > { %p917_p1 = scmp.lt.s32.totalorder %s657_s14, 3  ;;  %p918_p2 = scmp.ge.s32.totalorder %s657_s14, 1 }
  0x32   : > { %s409_s15 = sshll.u32 %s747_s25, 2  ;;  %s423_s16 = sshll.u32 %s653_s13, 6 }
  0x33   : > { %p797_p9 = pnand %p918_p2, %p917_p1  ;;  %s806_s20 = scalar_lea.hbm %s908_s1, %s423_s16 }
  0x34   : > { %s161_s26 = scalar_lea.vmem [#allocation5], %s409_s15  ;;  %s158_s4 = scalar_lea.sflag [#allocation6], %s747_s25 }
  0x35   : > { %s170_s27 = sshll.u32 %s161_s26, 4  ;;  %s541_s5 = scalar_lea.hbm %s806_s20, 64  ;;  %s808_s27 = int_to_ptr.vmem [resolvable:$true] %s170_s27 }
  0x36   : > { %p542_p11 = scmp.ne.s32.totalorder %s806_s20, %s541_s5  ;;  %s546_s29 = scalar_lea.hbm %s908_s1, 128 }
  0x37   : > { %p547_p3 = scmp.lt.u32.totalorder %s806_s20, %s908_s1  ;;  %p548_p6 = scmp.lt.u32.totalorder %s546_s29, %s541_s5 }
  0x38   : > { %p544_p7 = pnand %p542_p11, %p512_p5  ;;  %p550_p10 = scmp.lt.u32.totalorder %s541_s5, %s806_s20 }
  0x39   : > { %p549_p4 = por %p548_p6, %p547_p3 }
  0x3a   : > { %p545_p13 = pneg %p544_p7 }
  0x3b   : > { %p551_p12 = por %p550_p10, %p549_p4 }
  0x3d   : > { %p552_p1 = pnand %p551_p12, %p545_p13 }
  0x3f   : > { %555 = shalt.err (!%p552_p1)
}
  0x40   : > { %s556_s15 = scalar_lea.vmem %s808_s27, 64  ;;  %s662_s16 = smov [#allocation5]  }
  0x41   : > { %p557_p2 = scmp.ne.s32.totalorder %s808_s27, %s556_s15  ;;  %s561_s18 = sshll.u32 %s662_s16, 4  ;;  %s562_s18 = int_to_ptr.vmem [resolvable:$false] %s561_s18 }
  0x42   : > { %s563_s19 = scalar_lea.vmem %s562_s18, 128  ;;  %p564_p8 = scmp.lt.s32.totalorder %s808_s27, %s562_s18 }
  0x43   : > { %p559_p11 = pnand %p557_p2, %p512_p5  ;;  %p565_p3 = scmp.lt.s32.totalorder %s563_s19, %s556_s15 }
  0x45   : > { %p560_p7 = pneg %p559_p11  ;;  %p566_p6 = por %p565_p3, %p564_p8 }
  0x47   : > { %p567_p4 = pnand %p566_p6, %p560_p7 }
  0x49   : > { %570 = shalt.err (!%p567_p4)
}
  0x4a   : > { %s663_s26 = smov 32   ;;  %s664_s5 = smov 2  }
  0x4b   : > { %442 = dma.hbm_to_vmem [thread:$0]  (!%p760_p0), %s806_s20, 64, %s808_s27, %s158_s4, %s663_s26, %s663_s26, %s664_s5  }
  0x4c   : > { %182 = sbr.rel (%p797_p9) target bundleno = 342 (0x156), region = 28  ;;  %s839_s7 = sand.u32 (!%p797_p9), 1, %s641_s10  }
  0x4d   : > { %s413_s28 = sshll.u32 (!%p797_p9), %s839_s7, 4  ;;  %s185_s29 = scalar_lea.sflag (!%p797_p9), [#allocation3], %s839_s7 }
  0x4e   : > { %s188_s30 = scalar_lea.vmem (!%p797_p9), [#allocation2], %s413_s28  ;;  %p920_p8 = scmp.ne.s32.totalorder (!%p797_p9), %s913_s21, 0 }
  0x53   : > { %624 = dma.done.wait (%p920_p8), %s185_s29, 256  }
  0x54   : > { %626 = vsyncadd (%p920_p8), %s185_s29, 4294967040  ;;  %s414_s25 = sshll.u32 %s839_s7, 2  ;;  %s194_s6 = scalar_lea.sflag [#allocation6], %s839_s7 }
  0x55   : > { %s197_s8 = scalar_lea.vmem [#allocation5], %s414_s25 }
  0x56   : > { %628 = dma.done.wait (%p920_p8), %s194_s6, 64  }
  0x57   : > { %630 = vsyncadd (%p920_p8), %s194_s6, 4294967232  ;;  %v225_v0 = vld [vmem:[%s188_s30] sm:$0xff]  ;;  %v226_v1 = vld [vmem:[%s188_s30 + $0x8] sm:$0xff]  ;;  %v665_v14 = vmov 0.0   ;;  %vm256_vm2 = vcmask 130048   ;;  %v249_v32 = vlaneseq  ;;  %s415_s21 = sshll.u32 %s839_s7, 3 }
  0x58   : > { %v416_v2 = vmul.f32 -1.442695, %v225_v0  ;;  %v417_v3 = vmul.f32 -1.442695, %v226_v1  ;;  %v425_v4 = vld [vmem:[%s197_s8] sm:$0xf]  }
  0x59   : > { %v426_v9 = vunpack.c.0.s8 %v425_v4  ;;  %v427_v10 = vunpack.c.1.s8 %v425_v4  ;;  %v250_v33 = vand.u32 127, %v249_v32  ;;  %s419_s20 = sshll.u32 %s649_s12, 7  ;;  %s222_s4 = scalar_lea.vmem [#allocation7], %s415_s21 }
  0x5a   : > { %502 = vpow2.f32 %v416_v2  ;;  %s294_s3 = sshll.u32 %s222_s4, 4  ;;  %s858_s18 = scalar_lea.hbm %s909_s2, %s419_s20  ;;  %s860_s3 = int_to_ptr.vmem [resolvable:$true] %s294_s3 }
  0x5b   : > { %504 = vpow2.f32 %v417_v3  ;;  %v243_v11 = vcvt.s32.f32 %v426_v9  ;;  %v244_v12 = vcvt.s32.f32 %v427_v10  ;;  %vm251_vm3 = vcmp.eq.s32.totalorder %v250_v33, 0  ;;  %s281_s19 = scalar_lea.sflag [#allocation4], %s839_s7  ;;  %s571_s26 = scalar_lea.vmem %s860_s3, 128 }
  0x5c   : > { %p572_p0 = scmp.ne.s32.totalorder %s860_s3, %s571_s26  ;;  %p921_p5 = scmp.ne.s32.totalorder %s914_s22, 0 }
  0x5d   : > { %vm245_vm0 = vcmp.eq.f32.partialorder %v243_v11, 0.0  ;;  %vm246_vm1 = vcmp.eq.f32.partialorder %v244_v12, 0.0  ;;  %s666_s12 = smov [#allocation7]  }
  0x5e   : > { %v247_v15 = vsel %vm245_vm0, 1.0, %v665_v14  ;;  %v248_v17 = vsel %vm246_vm1, 1.0, %v665_v14  ;;  %p573_p9 = pnand %p572_p0, %p921_p5  ;;  %s575_s5 = sshll.u32 %s666_s12, 4  ;;  %s576_s5 = int_to_ptr.vmem [resolvable:$false] %s575_s5 }
  0x5f   : > { %s577_s28 = scalar_lea.vmem %s576_s5, 256  ;;  %p578_p10 = scmp.lt.s32.totalorder %s860_s3, %s576_s5 }
  0x60   : > { %p574_p13 = pneg %p573_p9  ;;  %p579_p12 = scmp.lt.s32.totalorder %s577_s28, %s571_s26 }
  0x62   : > { %p580_p1 = por %p579_p12, %p578_p10 }
  0x64   : > { %v503_v5 = vpop.eup %502  ;;  %p581_p2 = pnand %p580_p1, %p574_p13 }
  0x65   : > { %v505_v6 = vpop.eup %504  ;;  %v233_v7 = vadd.f32 1.0, %v503_v5 }
  0x66   : > { %v234_v8 = vadd.f32 1.0, %v505_v6 }
  0x67   : > { %506 = vrcp.f32 %v233_v7 }
  0x68   : > { %508 = vrcp.f32 %v234_v8 }
  0x71   : > { %v507_v13 = vpop.eup %506 }
  0x72   : > { %v509_v16 = vpop.eup %508  ;;  %v252_v18 = vmul.f32 %v507_v13, %v507_v13 }
  0x73   : > { %v253_v19 = vmul.f32 %v509_v16, %v509_v16 }
  0x74   : > { %v254_v20 = vmul.f32 %v252_v18, %v247_v15 }
  0x75   : > { %v255_v21 = vmul.f32 %v253_v19, %v248_v17 }
  0x76   : > { %v257_v22 = vsel %vm256_vm2, %v254_v20, 0.0 }
  0x77   : > { %v258_v23 = vsel %vm256_vm2, %v255_v21, 0.0 }
  0x78   : > { %v259_v24 = vadd.f32 %v258_v23, %v257_v22 }
  0x7a   : > { %260 = vadd.xlane.f32.xlu0 %v259_v24 }
 0x107   : > { %v261_v25 = vpop.xlane.xlu0 %260 }
 0x108   : > { %v262_v26 = vrot.slane %v261_v25, 4 }
 0x10a   : > { %v263_v27 = vadd.f32 %v262_v26, %v261_v25 }
 0x10c   : > { %v264_v28 = vrot.slane %v263_v27, 2 }
 0x10e   : > { %v265_v29 = vadd.f32 %v264_v28, %v263_v27 }
 0x110   : > { %v266_v30 = vrot.slane %v265_v29, 1 }
 0x112   : > { %v267_v31 = vadd.f32 %v266_v30, %v265_v29 }
 0x114   : > { %428 = vpush %v267_v31 }
 0x145   : > { %s429_s27 = spop %428 }
 0x146   : > { %v269_v34 = vstv %s429_s27 }
 0x147   : > { %v270_v35 = vsel %vm251_vm3, %v269_v34, 0.0 }
 0x148   : > { %279 = vst [vmem:[%s222_s4] sm:$0xff] %v270_v35 }
 0x149   : > { %584 = shalt.err (!%p581_p2)
}
 0x14a   : > { %s585_s7 = scalar_lea.hbm %s858_s18, 128  ;;  %s589_s25 = scalar_lea.hbm %s909_s2, 256 }
 0x14b   : > { %p586_p11 = scmp.ne.s32.totalorder %s858_s18, %s585_s7  ;;  %p590_p6 = scmp.lt.u32.totalorder %s858_s18, %s909_s2 }
 0x14c   : > { %p591_p4 = scmp.lt.u32.totalorder %s589_s25, %s585_s7  ;;  %p593_p0 = scmp.lt.u32.totalorder %s585_s7, %s858_s18 }
 0x14d   : > { %p587_p7 = pnand %p586_p11, %p921_p5 }
 0x14e   : > { %p592_p8 = por %p591_p4, %p590_p6 }
 0x14f   : > { %p588_p3 = pneg %p587_p7 }
 0x150   : > { %p594_p9 = por %p593_p0, %p592_p8 }
 0x152   : > { %p595_p13 = pnand %p594_p9, %p588_p3 }
 0x154   : > { %598 = shalt.err (!%p595_p13)
}
 0x155   : > { %434 = dma.vmem_to_hbm [thread:$0]  (%p921_p5), %s860_s3, 128, %s858_s18, %s281_s19  }
 0x156 PF: > { %s306_s21 = sand.u32 1, %s637_s9   ;;  %p922_p10 = scmp.ne.s32.totalorder %s915_s24, 0 }
 0x157   : > { %p923_p12 = scmp.ge.s32.totalorder %s657_s14, 2  ;;  %s307_s20 = scalar_lea.sflag [#allocation4], %s306_s21 }
 0x159   : > { %p444_p1 = pnand %p923_p12, %p922_p10 }
 0x15b   : > { %632 = dma.done.wait (!%p444_p1), %s307_s20, 128  }
 0x15c   : > { %634 = vsyncadd (!%p444_p1), %s307_s20, 4294967168  ;;  %s21_s14 = sadd.s32 1, %s657_s14   ;;  %s924_s9 = smov %s641_s10 }
 0x15d   : > { %p18_p2 = scmp.ge.s32.totalorder %s21_s14, 4   ;;  %s925_s10 = smov %s645_s11 }
 0x15e   : > { %s926_s11 = smov %s738_s23  ;;  %s927_s12 = smov %s653_s13 }
 0x15f   : > { %s928_s13 = smov %s930_s17  ;;  %20 = sbr.rel (!%p18_p2) target bundleno = 8 (0x8), region = 90 }
 0x166   :  { %312 = vsyncpa [#allocation3], 1 }
 0x167   :  { %314 = vsyncpa [#allocation3 + $0x1], 1 }
 0x168   :  { %315 = vsyncpa [#allocation6], 1 }
 0x169   :  { %317 = vsyncpa [#allocation6 + $0x1], 1 }
 0x16a   :  { %318 = vsyncpa [#allocation4], 1 }
 0x16b   :  { %320 = vsyncpa [#allocation4 + $0x1], 1 }

</bundles_post_ra>
